<compile_context>
chip_gen: v7x
topology: tpu7x:2x2x1
jax: 0.10.0
libtpu: 0.0.40
codegen_flags: <defaults>
</compile_context>

<pallas_src>
import functools

import jax
import jax.numpy as jnp
from jax import lax
from jax.experimental import pallas as pl
from jax.experimental.pallas import tpu as pltpu

LN_EPS = 1e-5                    # torch.nn.LayerNorm default
_INV_SQRT2 = 0.7071067811865476  # 1/sqrt(2) for exact (erf) GELU


def _pick_tile(n, candidates=(512, 256, 128)):
    """Largest lane/sublane-friendly tile that divides n, else the full dim."""
    for t in candidates:
        if n >= t and n % t == 0:
            return t
    return n


# ------------- Kernel 1: LayerNorm + fused Q/K/V projection (seq tile) -------------
def ln_qkv_kernel(x_ref, g_ref, b_ref, wqkv_ref, qkv_ref):
    x = x_ref[...]                                              # (ts, D) f32
    mu = jnp.mean(x, axis=-1, keepdims=True)
    var = jnp.mean((x - mu) ** 2, axis=-1, keepdims=True)
    xn = (x - mu) * lax.rsqrt(var + LN_EPS) * g_ref[...] + b_ref[...]
    qkv = jnp.dot(xn.astype(wqkv_ref.dtype), wqkv_ref[...],
                  preferred_element_type=jnp.float32)           # (ts, 3*inner)
    qkv_ref[...] = qkv.astype(qkv_ref.dtype)


# ------------- Kernel 2: attention core, all heads of one batch element ------------
def attn_kernel(q_ref, k_ref, v_ref, o_ref):
    q = q_ref[...]                                              # (heads, S, dh), pre-scaled
    k = k_ref[...]
    v = v_ref[...]
    s = jnp.einsum("hqd,hkd->hqk", q, k, preferred_element_type=jnp.float32)
    s = s - jnp.max(s, axis=-1, keepdims=True)
    p = jnp.exp(s)
    p = p * pl.reciprocal(jnp.sum(p, axis=-1, keepdims=True), approx=True)
    o = jnp.einsum("hqk,hkd->hqd", p.astype(v.dtype), v,
                   preferred_element_type=jnp.float32)
    o_ref[...] = o.astype(o_ref.dtype)


# ------------- Kernel 3: out-proj + residual, LN + FFN + residual (seq & H tiles) --
def proj_ffn_kernel(x_ref, ao_ref, wp_ref, bp_ref, g2_ref, b2_ref,
                    w1_ref, b1_ref, w2_ref, bb2_ref, o_ref, x1_scr, acc_scr):
    kh = pl.program_id(2)

    @pl.when(kh == 0)
    def _():
        x = x_ref[...]                                          # (ts, D) f32
        proj = jnp.dot(ao_ref[...], wp_ref[...],
                       preferred_element_type=jnp.float32)
        x1_scr[...] = x + proj + bp_ref[...]                    # Dropout = identity
        acc_scr[...] = jnp.zeros_like(acc_scr)

    x1 = x1_scr[...]
    mu = jnp.mean(x1, axis=-1, keepdims=True)
    var = jnp.mean((x1 - mu) ** 2, axis=-1, keepdims=True)
    xn = (x1 - mu) * lax.rsqrt(var + LN_EPS) * g2_ref[...] + b2_ref[...]
    h = jnp.dot(xn.astype(w1_ref.dtype), w1_ref[...],
                preferred_element_type=jnp.float32) + b1_ref[...]
    h = 0.5 * h * (1.0 + lax.erf(h * _INV_SQRT2))               # exact nn.GELU()
    acc_scr[...] += jnp.dot(h.astype(w2_ref.dtype), w2_ref[...],
                            preferred_element_type=jnp.float32)

    @pl.when(kh == pl.num_programs(2) - 1)
    def _():
        o_ref[...] = x1 + acc_scr[...] + bb2_ref[...]


# ----------------------------------- weight prep -----------------------------------
def prepare_params(params, *, heads, dim_head, compute_dtype=jnp.bfloat16):
    """One-time weight transpose / cast / fuse (kept outside the jitted forward)."""
    D = params["wq"].shape[1]
    H = params["w1"].shape[0]
    scale = dim_head ** (-0.5)
    f32 = jnp.float32
    wqkv_t = jnp.concatenate(
        [params["wq"].T * scale, params["wk"].T, params["wv"].T],
        axis=1).astype(compute_dtype)                           # (D, 3*inner), Q pre-scaled
    return dict(
        g1=params["ln1_g"].reshape(1, D).astype(f32),
        b1=params["ln1_b"].reshape(1, D).astype(f32),
        wqkv_t=wqkv_t,
        wp_t=params["wp"].T.astype(compute_dtype),              # (inner, D)
        bp=params["bp"].reshape(1, D).astype(f32),
        g2=params["ln2_g"].reshape(1, D).astype(f32),
        b2=params["ln2_b"].reshape(1, D).astype(f32),
        w1_t=params["w1"].T.astype(compute_dtype),              # (D, H)
        bb1=params["b1"].reshape(1, H).astype(f32),
        w2_t=params["w2"].T.astype(compute_dtype),              # (H, D)
        bb2=params["b2"].reshape(1, D).astype(f32),
    )


# ----------------------------------- wrapper ---------------------------------------
def transformer_block(x, prep, *, heads, dim_head):
    b, S, D = x.shape
    inner = heads * dim_head
    H = prep["w1_t"].shape[1]
    cdt = prep["wqkv_t"].dtype
    f32 = jnp.float32

    ts = _pick_tile(S)
    ns = S // ts
    th = _pick_tile(H)
    nh = H // th

    # ---- LayerNorm + fused QKV ----
    qkv = pl.pallas_call(
        ln_qkv_kernel,
        grid=(b, ns),
        in_specs=[
            pl.BlockSpec((None, ts, D), lambda ib, i: (ib, i, 0)),
            pl.BlockSpec((1, D), lambda ib, i: (0, 0)),
            pl.BlockSpec((1, D), lambda ib, i: (0, 0)),
            pl.BlockSpec((D, 3 * inner), lambda ib, i: (0, 0)),
        ],
        out_specs=pl.BlockSpec((None, ts, 3 * inner), lambda ib, i: (ib, i, 0)),
        out_shape=jax.ShapeDtypeStruct((b, S, 3 * inner), cdt),
        compiler_params=pltpu.CompilerParams(
            dimension_semantics=("parallel", "parallel")),
        cost_estimate=pl.CostEstimate(
            flops=2 * b * S * D * 3 * inner + 10 * b * S * D,
            transcendentals=b * S,
            bytes_accessed=b * S * D * 4 + D * 3 * inner * 2 + b * S * 3 * inner * 2),
    )(x, prep["g1"], prep["b1"], prep["wqkv_t"])

    # Quirky PyTorch head split: raw row-major reshape (matches .reshape(b,-1,c,dh)).
    q = qkv[..., :inner].reshape(b, heads, S, dim_head)
    k = qkv[..., inner:2 * inner].reshape(b, heads, S, dim_head)
    v = qkv[..., 2 * inner:].reshape(b, heads, S, dim_head)

    # ---- attention core (all heads per batch element, batched einsum) ----
    attn = pl.pallas_call(
        attn_kernel,
        grid=(b,),
        in_specs=[pl.BlockSpec((None, heads, S, dim_head),
                               lambda ib: (ib, 0, 0, 0))] * 3,
        out_specs=pl.BlockSpec((None, heads, S, dim_head),
                               lambda ib: (ib, 0, 0, 0)),
        out_shape=jax.ShapeDtypeStruct((b, heads, S, dim_head), cdt),
        compiler_params=pltpu.CompilerParams(dimension_semantics=("parallel",)),
        cost_estimate=pl.CostEstimate(
            flops=4 * b * heads * S * S * dim_head + 6 * b * heads * S * S,
            transcendentals=b * heads * S * S,
            bytes_accessed=4 * b * heads * S * dim_head * 2),
    )(q, k, v)

    ao = attn.reshape(b, S, inner)          # == torch: out.reshape(b, c, -1)

    # ---- out-proj + residual, LN + FFN + residual ----
    out = pl.pallas_call(
        proj_ffn_kernel,
        grid=(b, ns, nh),
        in_specs=[
            pl.BlockSpec((None, ts, D), lambda ib, i, kh: (ib, i, 0)),
            pl.BlockSpec((None, ts, inner), lambda ib, i, kh: (ib, i, 0)),
            pl.BlockSpec((inner, D), lambda ib, i, kh: (0, 0)),
            pl.BlockSpec((1, D), lambda ib, i, kh: (0, 0)),
            pl.BlockSpec((1, D), lambda ib, i, kh: (0, 0)),
            pl.BlockSpec((1, D), lambda ib, i, kh: (0, 0)),
            pl.BlockSpec((D, th), lambda ib, i, kh: (0, kh)),
            pl.BlockSpec((1, th), lambda ib, i, kh: (0, kh)),
            pl.BlockSpec((th, D), lambda ib, i, kh: (kh, 0)),
            pl.BlockSpec((1, D), lambda ib, i, kh: (0, 0)),
        ],
        out_specs=pl.BlockSpec((None, ts, D), lambda ib, i, kh: (ib, i, 0)),
        out_shape=jax.ShapeDtypeStruct((b, S, D), f32),
        scratch_shapes=[pltpu.VMEM((ts, D), jnp.float32),
                        pltpu.VMEM((ts, D), jnp.float32)],
        compiler_params=pltpu.CompilerParams(
            dimension_semantics=("parallel", "parallel", "arbitrary")),
        cost_estimate=pl.CostEstimate(
            flops=2 * b * S * (inner * D + 2 * D * H) + 20 * b * S * (D + H),
            transcendentals=b * S * (H + 1),
            bytes_accessed=(2 * b * S * D * 4 + b * S * inner * 2
                            + (inner * D + 2 * D * H) * 2)),
    )(x, ao, prep["wp_t"], prep["bp"], prep["g2"], prep["b2"],
      prep["w1_t"], prep["bb1"], prep["w2_t"], prep["bb2"])
    return out


# ------------------------------ plain-JAX reference --------------------------------
def reference(x, params, *, heads, dim_head):
    def ln(z, g, b_):
        mu = z.mean(-1, keepdims=True)
        var = ((z - mu) ** 2).mean(-1, keepdims=True)
        return (z - mu) / jnp.sqrt(var + LN_EPS) * g + b_

    b, S, D = x.shape
    xn = ln(x, params["ln1_g"], params["ln1_b"])
    q = (xn @ params["wq"].T).reshape(b, heads, S, dim_head)
    k = (xn @ params["wk"].T).reshape(b, heads, S, dim_head)
    v = (xn @ params["wv"].T).reshape(b, heads, S, dim_head)
    dots = jnp.einsum("bhqd,bhkd->bhqk", q, k) * (dim_head ** -0.5)
    attn = jax.nn.softmax(dots, axis=-1)
    out = jnp.einsum("bhqk,bhkd->bhqd", attn, v).reshape(b, S, -1)
    x1 = x + out @ params["wp"].T + params["bp"]
    h = jax.nn.gelu(ln(x1, params["ln2_g"], params["ln2_b"]) @ params["w1"].T
                    + params["b1"], approximate=False)
    return x1 + h @ params["w2"].T + params["b2"]


def init_params(key, dim, heads, dim_head, mlp_dim):
    inner = heads * dim_head
    ks = jax.random.split(key, 8)
    w = lambda k_, shp: 0.05 * jax.random.normal(k_, shp, jnp.float32)
    return dict(
        ln1_g=jnp.ones((dim,), jnp.float32), ln1_b=jnp.zeros((dim,), jnp.float32),
        wq=w(ks[0], (inner, dim)), wk=w(ks[1], (inner, dim)), wv=w(ks[2], (inner, dim)),
        wp=w(ks[3], (dim, inner)), bp=w(ks[4], (dim,)),
        ln2_g=jnp.ones((dim,), jnp.float32), ln2_b=jnp.zeros((dim,), jnp.float32),
        w1=w(ks[5], (mlp_dim, dim)), b1=w(ks[6], (mlp_dim,)),
        w2=w(ks[7], (dim, mlp_dim)), b2=jnp.zeros((dim,), jnp.float32),
    )


if __name__ == "__main__":
    batch, seq, dim = 2, 8, 32
    heads, dim_head, mlp_dim = 4, 16, 64

    key = jax.random.PRNGKey(0)
    kx, kp = jax.random.split(key)
    x = jax.random.normal(kx, (batch, seq, dim), jnp.float32)
    params = init_params(kp, dim, heads, dim_head, mlp_dim)

    prep = prepare_params(params, heads=heads, dim_head=dim_head)   # once, outside jit
    fwd = jax.jit(functools.partial(transformer_block, heads=heads, dim_head=dim_head))

    y = jax.block_until_ready(fwd(x, prep))

    y_ref = reference(x, params, heads=heads, dim_head=dim_head)
    assert y.shape == (batch, seq, dim)
    err = float(jnp.max(jnp.abs(y - y_ref)))
    assert jnp.allclose(y, y_ref, atol=2e-2, rtol=2e-2), err
    print("KERNEL_OK")
</pallas_src>

<mosaic_0001>
module attributes {stable_mosaic.version = 11 : i64} {
  func.func @ln_qkv_kernel(%arg0: i32, %arg1: i32, %arg2: memref<1x8x32xf32, #tpu.memory_space<vmem>>, %arg3: memref<1x32xf32, #tpu.memory_space<vmem>>, %arg4: memref<1x32xf32, #tpu.memory_space<vmem>>, %arg5: memref<32x192xbf16, #tpu.memory_space<vmem>>, %arg6: memref<1x8x192xbf16, #tpu.memory_space<vmem>>) attributes {dimension_semantics = [#tpu.dimension_semantics<parallel>, #tpu.dimension_semantics<parallel>], iteration_bounds = array<i64: 2, 1>, scalar_prefetch = 0 : i64, scratch_operands = 0 : i64, tpu.core_type = #tpu.core_type<tc>, window_params = [{transform_indices = @transform_0, window_bounds = array<i64: 1, 8, 32>}, {pipeline_mode = #tpu.pipeline_mode<synchronous>, transform_indices = @transform_1, window_bounds = array<i64: 1, 32>}, {pipeline_mode = #tpu.pipeline_mode<synchronous>, transform_indices = @transform_2, window_bounds = array<i64: 1, 32>}, {pipeline_mode = #tpu.pipeline_mode<synchronous>, transform_indices = @transform_3, window_bounds = array<i64: 32, 192>}, {transform_indices = @transform_4, window_bounds = array<i64: 1, 8, 192>}]} {
    %c0 = arith.constant 0 : index
    %c0_0 = arith.constant 0 : index
    %c0_1 = arith.constant 0 : index
    %0 = vector.load %arg2[%c0, %c0_0, %c0_1] : memref<1x8x32xf32, #tpu.memory_space<vmem>>, vector<1x8x32xf32>
    %1 = vector.shape_cast %0 : vector<1x8x32xf32> to vector<8x32xf32>
    %cst = arith.constant dense<0.000000e+00> : vector<8xf32>
    %2 = vector.multi_reduction <add>, %1, %cst [1] : vector<8x32xf32> to vector<8xf32>
    %3 = vector.shape_cast %2 : vector<8xf32> to vector<8x1xf32>
    %cst_2 = arith.constant 3.200000e+01 : f32
    %4 = vector.broadcast %cst_2 : f32 to vector<8x1xf32>
    %5 = arith.divf %3, %4 : vector<8x1xf32>
    %6 = vector.broadcast %5 : vector<8x1xf32> to vector<8x32xf32>
    %7 = arith.subf %1, %6 : vector<8x32xf32>
    %8 = arith.mulf %7, %7 : vector<8x32xf32>
    %cst_3 = arith.constant dense<0.000000e+00> : vector<8xf32>
    %9 = vector.multi_reduction <add>, %8, %cst_3 [1] : vector<8x32xf32> to vector<8xf32>
    %10 = vector.shape_cast %9 : vector<8xf32> to vector<8x1xf32>
    %cst_4 = arith.constant 3.200000e+01 : f32
    %11 = vector.broadcast %cst_4 : f32 to vector<8x1xf32>
    %12 = arith.divf %10, %11 : vector<8x1xf32>
    %13 = vector.broadcast %5 : vector<8x1xf32> to vector<8x32xf32>
    %14 = arith.subf %1, %13 : vector<8x32xf32>
    %cst_5 = arith.constant 9.99999974E-6 : f32
    %15 = vector.broadcast %cst_5 : f32 to vector<8x1xf32>
    %16 = arith.addf %12, %15 : vector<8x1xf32>
    %17 = math.rsqrt %16 : vector<8x1xf32>
    %18 = vector.broadcast %17 : vector<8x1xf32> to vector<8x32xf32>
    %19 = arith.mulf %14, %18 : vector<8x32xf32>
    %c0_6 = arith.constant 0 : index
    %c0_7 = arith.constant 0 : index
    %20 = vector.load %arg3[%c0_6, %c0_7] : memref<1x32xf32, #tpu.memory_space<vmem>>, vector<1x32xf32>
    %21 = vector.broadcast %20 : vector<1x32xf32> to vector<8x32xf32>
    %22 = arith.mulf %19, %21 : vector<8x32xf32>
    %c0_8 = arith.constant 0 : index
    %c0_9 = arith.constant 0 : index
    %23 = vector.load %arg4[%c0_8, %c0_9] : memref<1x32xf32, #tpu.memory_space<vmem>>, vector<1x32xf32>
    %24 = vector.broadcast %23 : vector<1x32xf32> to vector<8x32xf32>
    %25 = arith.addf %22, %24 : vector<8x32xf32>
    %26 = arith.truncf %25 : vector<8x32xf32> to vector<8x32xbf16>
    %c0_10 = arith.constant 0 : index
    %c0_11 = arith.constant 0 : index
    %27 = vector.load %arg5[%c0_10, %c0_11] : memref<32x192xbf16, #tpu.memory_space<vmem>>, vector<32x192xbf16>
    %cst_12 = arith.constant dense<0.000000e+00> : vector<8x192xf32>
    %28 = tpu.matmul %26, %27, %cst_12 {dimension_numbers = #tpu.dot_dimension_numbers<[1], [0], [0], [1], [0, 0, 1, 1], [], []>} : vector<8x32xbf16>, vector<32x192xbf16>, vector<8x192xf32> -> vector<8x192xf32>
    %29 = arith.truncf %28 : vector<8x192xf32> to vector<8x192xbf16>
    %c0_13 = arith.constant 0 : index
    %c0_14 = arith.constant 0 : index
    %c0_15 = arith.constant 0 : index
    %30 = vector.load %arg6[%c0_13, %c0_14, %c0_15] : memref<1x8x192xbf16, #tpu.memory_space<vmem>>, vector<1x8x192xbf16>
    %31 = vector.shape_cast %30 : vector<1x8x192xbf16> to vector<8x192xbf16>
    %32 = vector.shape_cast %29 : vector<8x192xbf16> to vector<1x8x192xbf16>
    tpu.vector_store %arg6[%c0_13, %c0_14, %c0_15], %32 {strides = array<i32>} : memref<1x8x192xbf16, #tpu.memory_space<vmem>>, vector<1x8x192xbf16>,
    return
  }
  func.func @transform_0(%arg0: i32, %arg1: i32) -> (i32, i32, i32) {
    %c0_i32 = arith.constant 0 : i32
    %c0_i32_0 = arith.constant 0 : i32
    return %arg0, %arg1, %c0_i32 : i32, i32, i32
  }
  func.func @transform_1(%arg0: i32, %arg1: i32) -> (i32, i32) {
    %c0_i32 = arith.constant 0 : i32
    %c0_i32_0 = arith.constant 0 : i32
    %c0_i32_1 = arith.constant 0 : i32
    return %c0_i32, %c0_i32_0 : i32, i32
  }
  func.func @transform_2(%arg0: i32, %arg1: i32) -> (i32, i32) {
    %c0_i32 = arith.constant 0 : i32
    %c0_i32_0 = arith.constant 0 : i32
    %c0_i32_1 = arith.constant 0 : i32
    return %c0_i32, %c0_i32_0 : i32, i32
  }
  func.func @transform_3(%arg0: i32, %arg1: i32) -> (i32, i32) {
    %c0_i32 = arith.constant 0 : i32
    %c0_i32_0 = arith.constant 0 : i32
    %c0_i32_1 = arith.constant 0 : i32
    return %c0_i32, %c0_i32_0 : i32, i32
  }
  func.func @transform_4(%arg0: i32, %arg1: i32) -> (i32, i32, i32) {
    %c0_i32 = arith.constant 0 : i32
    %c0_i32_0 = arith.constant 0 : i32
    return %arg0, %arg1, %c0_i32 : i32, i32, i32
  }
}

module attributes {stable_mosaic.version = 11 : i64} {
  func.func @attn_kernel(%arg0: i32, %arg1: memref<1x4x8x16xbf16, #tpu.memory_space<vmem>>, %arg2: memref<1x4x8x16xbf16, #tpu.memory_space<vmem>>, %arg3: memref<1x4x8x16xbf16, #tpu.memory_space<vmem>>, %arg4: memref<1x4x8x16xbf16, #tpu.memory_space<vmem>>) attributes {dimension_semantics = [#tpu.dimension_semantics<parallel>], iteration_bounds = array<i64: 2>, scalar_prefetch = 0 : i64, scratch_operands = 0 : i64, tpu.core_type = #tpu.core_type<tc>, window_params = [{transform_indices = @transform_0, window_bounds = array<i64: 1, 4, 8, 16>}, {transform_indices = @transform_1, window_bounds = array<i64: 1, 4, 8, 16>}, {transform_indices = @transform_2, window_bounds = array<i64: 1, 4, 8, 16>}, {transform_indices = @transform_3, window_bounds = array<i64: 1, 4, 8, 16>}]} {
    %c0 = arith.constant 0 : index
    %c0_0 = arith.constant 0 : index
    %c0_1 = arith.constant 0 : index
    %c0_2 = arith.constant 0 : index
    %0 = vector.load %arg1[%c0, %c0_0, %c0_1, %c0_2] : memref<1x4x8x16xbf16, #tpu.memory_space<vmem>>, vector<1x4x8x16xbf16>
    %1 = vector.shape_cast %0 : vector<1x4x8x16xbf16> to vector<4x8x16xbf16>
    %c0_3 = arith.constant 0 : index
    %c0_4 = arith.constant 0 : index
    %c0_5 = arith.constant 0 : index
    %c0_6 = arith.constant 0 : index
    %2 = vector.load %arg2[%c0_3, %c0_4, %c0_5, %c0_6] : memref<1x4x8x16xbf16, #tpu.memory_space<vmem>>, vector<1x4x8x16xbf16>
    %3 = vector.shape_cast %2 : vector<1x4x8x16xbf16> to vector<4x8x16xbf16>
    %c0_7 = arith.constant 0 : index
    %c0_8 = arith.constant 0 : index
    %c0_9 = arith.constant 0 : index
    %c0_10 = arith.constant 0 : index
    %4 = vector.load %arg3[%c0_7, %c0_8, %c0_9, %c0_10] : memref<1x4x8x16xbf16, #tpu.memory_space<vmem>>, vector<1x4x8x16xbf16>
    %5 = vector.shape_cast %4 : vector<1x4x8x16xbf16> to vector<4x8x16xbf16>
    "tpu.trace_start"() <{level = 10 : i32, message = "hqd,hkd->hqk"}> : () -> ()
    %cst = arith.constant dense<0.000000e+00> : vector<4x8x8xf32>
    %6 = tpu.matmul %1, %3, %cst {dimension_numbers = #tpu.dot_dimension_numbers<[2], [2], [1], [1], [0, 0, 0, 1, 1, 1], [0], [0]>} : vector<4x8x16xbf16>, vector<4x8x16xbf16>, vector<4x8x8xf32> -> vector<4x8x8xf32>
    "tpu.trace_stop"() : () -> ()
    %cst_11 = arith.constant dense<0xFF800000> : vector<4x8xf32>
    %7 = vector.multi_reduction <maximumf>, %6, %cst_11 [2] : vector<4x8x8xf32> to vector<4x8xf32>
    %8 = vector.shape_cast %7 : vector<4x8xf32> to vector<4x8x1xf32>
    %9 = vector.broadcast %8 : vector<4x8x1xf32> to vector<4x8x8xf32>
    %10 = arith.subf %6, %9 : vector<4x8x8xf32>
    %11 = math.exp %10 : vector<4x8x8xf32>
    %cst_12 = arith.constant dense<0.000000e+00> : vector<4x8xf32>
    %12 = vector.multi_reduction <add>, %11, %cst_12 [2] : vector<4x8x8xf32> to vector<4x8xf32>
    %13 = vector.shape_cast %12 : vector<4x8xf32> to vector<4x8x1xf32>
    %14 = tpu.reciprocal %13 {approx = true} : vector<4x8x1xf32> -> vector<4x8x1xf32>
    %15 = vector.broadcast %14 : vector<4x8x1xf32> to vector<4x8x8xf32>
    %16 = arith.mulf %11, %15 : vector<4x8x8xf32>
    %17 = arith.truncf %16 : vector<4x8x8xf32> to vector<4x8x8xbf16>
    "tpu.trace_start"() <{level = 10 : i32, message = "hqk,hkd->hqd"}> : () -> ()
    %cst_13 = arith.constant dense<0.000000e+00> : vector<4x8x16xf32>
    %18 = tpu.matmul %17, %5, %cst_13 {dimension_numbers = #tpu.dot_dimension_numbers<[2], [1], [1], [2], [0, 0, 0, 1, 1, 2], [0], [0]>} : vector<4x8x8xbf16>, vector<4x8x16xbf16>, vector<4x8x16xf32> -> vector<4x8x16xf32>
    "tpu.trace_stop"() : () -> ()
    %19 = arith.truncf %18 : vector<4x8x16xf32> to vector<4x8x16xbf16>
    %c0_14 = arith.constant 0 : index
    %c0_15 = arith.constant 0 : index
    %c0_16 = arith.constant 0 : index
    %c0_17 = arith.constant 0 : index
    %20 = vector.load %arg4[%c0_14, %c0_15, %c0_16, %c0_17] : memref<1x4x8x16xbf16, #tpu.memory_space<vmem>>, vector<1x4x8x16xbf16>
    %21 = vector.shape_cast %20 : vector<1x4x8x16xbf16> to vector<4x8x16xbf16>
    %22 = vector.shape_cast %19 : vector<4x8x16xbf16> to vector<1x4x8x16xbf16>
    tpu.vector_store %arg4[%c0_14, %c0_15, %c0_16, %c0_17], %22 {strides = array<i32>} : memref<1x4x8x16xbf16, #tpu.memory_space<vmem>>, vector<1x4x8x16xbf16>,
    return
  }
  func.func @transform_0(%arg0: i32) -> (i32, i32, i32, i32) {
    %c0_i32 = arith.constant 0 : i32
    %c0_i32_0 = arith.constant 0 : i32
    %c0_i32_1 = arith.constant 0 : i32
    %c0_i32_2 = arith.constant 0 : i32
    return %arg0, %c0_i32, %c0_i32_0, %c0_i32_1 : i32, i32, i32, i32
  }
  func.func @transform_1(%arg0: i32) -> (i32, i32, i32, i32) {
    %c0_i32 = arith.constant 0 : i32
    %c0_i32_0 = arith.constant 0 : i32
    %c0_i32_1 = arith.constant 0 : i32
    %c0_i32_2 = arith.constant 0 : i32
    return %arg0, %c0_i32, %c0_i32_0, %c0_i32_1 : i32, i32, i32, i32
  }
  func.func @transform_2(%arg0: i32) -> (i32, i32, i32, i32) {
    %c0_i32 = arith.constant 0 : i32
    %c0_i32_0 = arith.constant 0 : i32
    %c0_i32_1 = arith.constant 0 : i32
    %c0_i32_2 = arith.constant 0 : i32
    return %arg0, %c0_i32, %c0_i32_0, %c0_i32_1 : i32, i32, i32, i32
  }
  func.func @transform_3(%arg0: i32) -> (i32, i32, i32, i32) {
    %c0_i32 = arith.constant 0 : i32
    %c0_i32_0 = arith.constant 0 : i32
    %c0_i32_1 = arith.constant 0 : i32
    %c0_i32_2 = arith.constant 0 : i32
    return %arg0, %c0_i32, %c0_i32_0, %c0_i32_1 : i32, i32, i32, i32
  }
}

module attributes {stable_mosaic.version = 11 : i64} {
  func.func @proj_ffn_kernel(%arg0: i32, %arg1: i32, %arg2: i32, %arg3: memref<1x8x32xf32, #tpu.memory_space<vmem>>, %arg4: memref<1x8x64xbf16, #tpu.memory_space<vmem>>, %arg5: memref<64x32xbf16, #tpu.memory_space<vmem>>, %arg6: memref<1x32xf32, #tpu.memory_space<vmem>>, %arg7: memref<1x32xf32, #tpu.memory_space<vmem>>, %arg8: memref<1x32xf32, #tpu.memory_space<vmem>>, %arg9: memref<32x64xbf16, #tpu.memory_space<vmem>>, %arg10: memref<1x64xf32, #tpu.memory_space<vmem>>, %arg11: memref<64x32xbf16, #tpu.memory_space<vmem>>, %arg12: memref<1x32xf32, #tpu.memory_space<vmem>>, %arg13: memref<1x8x32xf32, #tpu.memory_space<vmem>>, %arg14: memref<8x32xf32, #tpu.memory_space<vmem>>, %arg15: memref<8x32xf32, #tpu.memory_space<vmem>>) attributes {dimension_semantics = [#tpu.dimension_semantics<parallel>, #tpu.dimension_semantics<parallel>, #tpu.dimension_semantics<arbitrary>], iteration_bounds = array<i64: 2, 1, 1>, scalar_prefetch = 0 : i64, scratch_operands = 2 : i64, tpu.core_type = #tpu.core_type<tc>, window_params = [{transform_indices = @transform_0, window_bounds = array<i64: 1, 8, 32>}, {transform_indices = @transform_1, window_bounds = array<i64: 1, 8, 64>}, {pipeline_mode = #tpu.pipeline_mode<synchronous>, transform_indices = @transform_2, window_bounds = array<i64: 64, 32>}, {pipeline_mode = #tpu.pipeline_mode<synchronous>, transform_indices = @transform_3, window_bounds = array<i64: 1, 32>}, {pipeline_mode = #tpu.pipeline_mode<synchronous>, transform_indices = @transform_4, window_bounds = array<i64: 1, 32>}, {pipeline_mode = #tpu.pipeline_mode<synchronous>, transform_indices = @transform_5, window_bounds = array<i64: 1, 32>}, {transform_indices = @transform_6, window_bounds = array<i64: 32, 64>}, {transform_indices = @transform_7, window_bounds = array<i64: 1, 64>}, {transform_indices = @transform_8, window_bounds = array<i64: 64, 32>}, {pipeline_mode = #tpu.pipeline_mode<synchronous>, transform_indices = @transform_9, window_bounds = array<i64: 1, 32>}, {transform_indices = @transform_10, window_bounds = array<i64: 1, 8, 32>}]} {
    %c0_i32 = arith.constant 0 : i32
    %0 = arith.cmpi eq, %arg2, %c0_i32 : i32
    %1 = arith.extui %0 : i1 to i32
    %c0_i32_0 = arith.constant 0 : i32
    %2 = arith.cmpi ne, %1, %c0_i32_0 : i32
    scf.if %2 {
      %c0_27 = arith.constant 0 : index
      %c0_28 = arith.constant 0 : index
      %c0_29 = arith.constant 0 : index
      %51 = vector.load %arg3[%c0_27, %c0_28, %c0_29] : memref<1x8x32xf32, #tpu.memory_space<vmem>>, vector<1x8x32xf32>
      %52 = vector.shape_cast %51 : vector<1x8x32xf32> to vector<8x32xf32>
      %c0_30 = arith.constant 0 : index
      %c0_31 = arith.constant 0 : index
      %c0_32 = arith.constant 0 : index
      %53 = vector.load %arg4[%c0_30, %c0_31, %c0_32] : memref<1x8x64xbf16, #tpu.memory_space<vmem>>, vector<1x8x64xbf16>
      %54 = vector.shape_cast %53 : vector<1x8x64xbf16> to vector<8x64xbf16>
      %c0_33 = arith.constant 0 : index
      %c0_34 = arith.constant 0 : index
      %55 = vector.load %arg5[%c0_33, %c0_34] : memref<64x32xbf16, #tpu.memory_space<vmem>>, vector<64x32xbf16>
      %cst_35 = arith.constant dense<0.000000e+00> : vector<8x32xf32>
      %56 = tpu.matmul %54, %55, %cst_35 {dimension_numbers = #tpu.dot_dimension_numbers<[1], [0], [0], [1], [0, 0, 1, 1], [], []>} : vector<8x64xbf16>, vector<64x32xbf16>, vector<8x32xf32> -> vector<8x32xf32>
      %57 = arith.addf %52, %56 : vector<8x32xf32>
      %c0_36 = arith.constant 0 : index
      %c0_37 = arith.constant 0 : index
      %58 = vector.load %arg6[%c0_36, %c0_37] : memref<1x32xf32, #tpu.memory_space<vmem>>, vector<1x32xf32>
      %59 = vector.broadcast %58 : vector<1x32xf32> to vector<8x32xf32>
      %60 = arith.addf %57, %59 : vector<8x32xf32>
      %c0_38 = arith.constant 0 : index
      %c0_39 = arith.constant 0 : index
      %61 = vector.load %arg14[%c0_38, %c0_39] : memref<8x32xf32, #tpu.memory_space<vmem>>, vector<8x32xf32>
      tpu.vector_store %arg14[%c0_38, %c0_39], %60 {strides = array<i32>} : memref<8x32xf32, #tpu.memory_space<vmem>>, vector<8x32xf32>,
      %cst_40 = arith.constant 0.000000e+00 : f32
      %62 = vector.broadcast %cst_40 : f32 to vector<8x32xf32>
      %c0_41 = arith.constant 0 : index
      %c0_42 = arith.constant 0 : index
      %63 = vector.load %arg15[%c0_41, %c0_42] : memref<8x32xf32, #tpu.memory_space<vmem>>, vector<8x32xf32>
      tpu.vector_store %arg15[%c0_41, %c0_42], %62 {strides = array<i32>} : memref<8x32xf32, #tpu.memory_space<vmem>>, vector<8x32xf32>,
    } else {
    }
    %c0 = arith.constant 0 : index
    %c0_1 = arith.constant 0 : index
    %3 = vector.load %arg14[%c0, %c0_1] : memref<8x32xf32, #tpu.memory_space<vmem>>, vector<8x32xf32>
    %cst = arith.constant dense<0.000000e+00> : vector<8xf32>
    %4 = vector.multi_reduction <add>, %3, %cst [1] : vector<8x32xf32> to vector<8xf32>
    %5 = vector.shape_cast %4 : vector<8xf32> to vector<8x1xf32>
    %cst_2 = arith.constant 3.200000e+01 : f32
    %6 = vector.broadcast %cst_2 : f32 to vector<8x1xf32>
    %7 = arith.divf %5, %6 : vector<8x1xf32>
    %8 = vector.broadcast %7 : vector<8x1xf32> to vector<8x32xf32>
    %9 = arith.subf %3, %8 : vector<8x32xf32>
    %10 = arith.mulf %9, %9 : vector<8x32xf32>
    %cst_3 = arith.constant dense<0.000000e+00> : vector<8xf32>
    %11 = vector.multi_reduction <add>, %10, %cst_3 [1] : vector<8x32xf32> to vector<8xf32>
    %12 = vector.shape_cast %11 : vector<8xf32> to vector<8x1xf32>
    %cst_4 = arith.constant 3.200000e+01 : f32
    %13 = vector.broadcast %cst_4 : f32 to vector<8x1xf32>
    %14 = arith.divf %12, %13 : vector<8x1xf32>
    %15 = vector.broadcast %7 : vector<8x1xf32> to vector<8x32xf32>
    %16 = arith.subf %3, %15 : vector<8x32xf32>
    %cst_5 = arith.constant 9.99999974E-6 : f32
    %17 = vector.broadcast %cst_5 : f32 to vector<8x1xf32>
    %18 = arith.addf %14, %17 : vector<8x1xf32>
    %19 = math.rsqrt %18 : vector<8x1xf32>
    %20 = vector.broadcast %19 : vector<8x1xf32> to vector<8x32xf32>
    %21 = arith.mulf %16, %20 : vector<8x32xf32>
    %c0_6 = arith.constant 0 : index
    %c0_7 = arith.constant 0 : index
    %22 = vector.load %arg7[%c0_6, %c0_7] : memref<1x32xf32, #tpu.memory_space<vmem>>, vector<1x32xf32>
    %23 = vector.broadcast %22 : vector<1x32xf32> to vector<8x32xf32>
    %24 = arith.mulf %21, %23 : vector<8x32xf32>
    %c0_8 = arith.constant 0 : index
    %c0_9 = arith.constant 0 : index
    %25 = vector.load %arg8[%c0_8, %c0_9] : memref<1x32xf32, #tpu.memory_space<vmem>>, vector<1x32xf32>
    %26 = vector.broadcast %25 : vector<1x32xf32> to vector<8x32xf32>
    %27 = arith.addf %24, %26 : vector<8x32xf32>
    %28 = arith.truncf %27 : vector<8x32xf32> to vector<8x32xbf16>
    %c0_10 = arith.constant 0 : index
    %c0_11 = arith.constant 0 : index
    %29 = vector.load %arg9[%c0_10, %c0_11] : memref<32x64xbf16, #tpu.memory_space<vmem>>, vector<32x64xbf16>
    %cst_12 = arith.constant dense<0.000000e+00> : vector<8x64xf32>
    %30 = tpu.matmul %28, %29, %cst_12 {dimension_numbers = #tpu.dot_dimension_numbers<[1], [0], [0], [1], [0, 0, 1, 1], [], []>} : vector<8x32xbf16>, vector<32x64xbf16>, vector<8x64xf32> -> vector<8x64xf32>
    %c0_13 = arith.constant 0 : index
    %c0_14 = arith.constant 0 : index
    %31 = vector.load %arg10[%c0_13, %c0_14] : memref<1x64xf32, #tpu.memory_space<vmem>>, vector<1x64xf32>
    %32 = vector.broadcast %31 : vector<1x64xf32> to vector<8x64xf32>
    %33 = arith.addf %30, %32 : vector<8x64xf32>
    %cst_15 = arith.constant 5.000000e-01 : f32
    %34 = vector.broadcast %cst_15 : f32 to vector<8x64xf32>
    %35 = arith.mulf %34, %33 : vector<8x64xf32>
    %cst_16 = arith.constant 0.707106769 : f32
    %36 = vector.broadcast %cst_16 : f32 to vector<8x64xf32>
    %37 = arith.mulf %33, %36 : vector<8x64xf32>
    %38 = math.erf %37 : vector<8x64xf32>
    %cst_17 = arith.constant 1.000000e+00 : f32
    %39 = vector.broadcast %cst_17 : f32 to vector<8x64xf32>
    %40 = arith.addf %39, %38 : vector<8x64xf32>
    %41 = arith.mulf %35, %40 : vector<8x64xf32>
    %c0_18 = arith.constant 0 : index
    %c0_19 = arith.constant 0 : index
    %42 = vector.load %arg15[%c0_18, %c0_19] : memref<8x32xf32, #tpu.memory_space<vmem>>, vector<8x32xf32>
    %43 = arith.truncf %41 : vector<8x64xf32> to vector<8x64xbf16>
    %c0_20 = arith.constant 0 : index
    %c0_21 = arith.constant 0 : index
    %44 = vector.load %arg11[%c0_20, %c0_21] : memref<64x32xbf16, #tpu.memory_space<vmem>>, vector<64x32xbf16>
    %cst_22 = arith.constant dense<0.000000e+00> : vector<8x32xf32>
    %45 = tpu.matmul %43, %44, %cst_22 {dimension_numbers = #tpu.dot_dimension_numbers<[1], [0], [0], [1], [0, 0, 1, 1], [], []>} : vector<8x64xbf16>, vector<64x32xbf16>, vector<8x32xf32> -> vector<8x32xf32>
    %46 = arith.addf %42, %45 : vector<8x32xf32>
    %c0_23 = arith.constant 0 : index
    %c0_24 = arith.constant 0 : index
    %47 = vector.load %arg15[%c0_23, %c0_24] : memref<8x32xf32, #tpu.memory_space<vmem>>, vector<8x32xf32>
    tpu.vector_store %arg15[%c0_23, %c0_24], %46 {strides = array<i32>} : memref<8x32xf32, #tpu.memory_space<vmem>>, vector<8x32xf32>,
    %c0_i32_25 = arith.constant 0 : i32
    %48 = arith.cmpi eq, %arg2, %c0_i32_25 : i32
    %49 = arith.extui %48 : i1 to i32
    %c0_i32_26 = arith.constant 0 : i32
    %50 = arith.cmpi ne, %49, %c0_i32_26 : i32
    scf.if %50 {
      %c0_27 = arith.constant 0 : index
      %c0_28 = arith.constant 0 : index
      %51 = vector.load %arg15[%c0_27, %c0_28] : memref<8x32xf32, #tpu.memory_space<vmem>>, vector<8x32xf32>
      %52 = arith.addf %3, %51 : vector<8x32xf32>
      %c0_29 = arith.constant 0 : index
      %c0_30 = arith.constant 0 : index
      %53 = vector.load %arg12[%c0_29, %c0_30] : memref<1x32xf32, #tpu.memory_space<vmem>>, vector<1x32xf32>
      %54 = vector.broadcast %53 : vector<1x32xf32> to vector<8x32xf32>
      %55 = arith.addf %52, %54 : vector<8x32xf32>
      %c0_31 = arith.constant 0 : index
      %c0_32 = arith.constant 0 : index
      %c0_33 = arith.constant 0 : index
      %56 = vector.load %arg13[%c0_31, %c0_32, %c0_33] : memref<1x8x32xf32, #tpu.memory_space<vmem>>, vector<1x8x32xf32>
      %57 = vector.shape_cast %56 : vector<1x8x32xf32> to vector<8x32xf32>
      %58 = vector.shape_cast %55 : vector<8x32xf32> to vector<1x8x32xf32>
      tpu.vector_store %arg13[%c0_31, %c0_32, %c0_33], %58 {strides = array<i32>} : memref<1x8x32xf32, #tpu.memory_space<vmem>>, vector<1x8x32xf32>,
    } else {
    }
    return
  }
  func.func @transform_0(%arg0: i32, %arg1: i32, %arg2: i32) -> (i32, i32, i32) {
    %c0_i32 = arith.constant 0 : i32
    %c0_i32_0 = arith.constant 0 : i32
    return %arg0, %arg1, %c0_i32 : i32, i32, i32
  }
  func.func @transform_1(%arg0: i32, %arg1: i32, %arg2: i32) -> (i32, i32, i32) {
    %c0_i32 = arith.constant 0 : i32
    %c0_i32_0 = arith.constant 0 : i32
    return %arg0, %arg1, %c0_i32 : i32, i32, i32
  }
  func.func @transform_2(%arg0: i32, %arg1: i32, %arg2: i32) -> (i32, i32) {
    %c0_i32 = arith.constant 0 : i32
    %c0_i32_0 = arith.constant 0 : i32
    %c0_i32_1 = arith.constant 0 : i32
    return %c0_i32, %c0_i32_0 : i32, i32
  }
  func.func @transform_3(%arg0: i32, %arg1: i32, %arg2: i32) -> (i32, i32) {
    %c0_i32 = arith.constant 0 : i32
    %c0_i32_0 = arith.constant 0 : i32
    %c0_i32_1 = arith.constant 0 : i32
    return %c0_i32, %c0_i32_0 : i32, i32
  }
  func.func @transform_4(%arg0: i32, %arg1: i32, %arg2: i32) -> (i32, i32) {
    %c0_i32 = arith.constant 0 : i32
    %c0_i32_0 = arith.constant 0 : i32
    %c0_i32_1 = arith.constant 0 : i32
    return %c0_i32, %c0_i32_0 : i32, i32
  }
  func.func @transform_5(%arg0: i32, %arg1: i32, %arg2: i32) -> (i32, i32) {
    %c0_i32 = arith.constant 0 : i32
    %c0_i32_0 = arith.constant 0 : i32
    %c0_i32_1 = arith.constant 0 : i32
    return %c0_i32, %c0_i32_0 : i32, i32
  }
  func.func @transform_6(%arg0: i32, %arg1: i32, %arg2: i32) -> (i32, i32) {
    %c0_i32 = arith.constant 0 : i32
    %c0_i32_0 = arith.constant 0 : i32
    return %c0_i32, %arg2 : i32, i32
  }
  func.func @transform_7(%arg0: i32, %arg1: i32, %arg2: i32) -> (i32, i32) {
    %c0_i32 = arith.constant 0 : i32
    %c0_i32_0 = arith.constant 0 : i32
    return %c0_i32, %arg2 : i32, i32
  }
  func.func @transform_8(%arg0: i32, %arg1: i32, %arg2: i32) -> (i32, i32) {
    %c0_i32 = arith.constant 0 : i32
    %c0_i32_0 = arith.constant 0 : i32
    return %arg2, %c0_i32 : i32, i32
  }
  func.func @transform_9(%arg0: i32, %arg1: i32, %arg2: i32) -> (i32, i32) {
    %c0_i32 = arith.constant 0 : i32
    %c0_i32_0 = arith.constant 0 : i32
    %c0_i32_1 = arith.constant 0 : i32
    return %c0_i32, %c0_i32_0 : i32, i32
  }
  func.func @transform_10(%arg0: i32, %arg1: i32, %arg2: i32) -> (i32, i32, i32) {
    %c0_i32 = arith.constant 0 : i32
    %c0_i32_0 = arith.constant 0 : i32
    return %arg0, %arg1, %c0_i32 : i32, i32, i32
  }
}

</mosaic_0001>

<bundles_post_ra>
// kernel: transformer_block.3
= control target key start
LH: loop header
LB: loop body
LE: loop exit
PB: predicated region body
PF: predicated region fallthrough
CT: control target
= control target key end

     0   :  { %9 = vsyncpa [#allocation3], 0  ;;  %s803_s0 = inlined_call_operand.vmem [shape: f32[2,8,32], index: 0, kind: input, shape index: {}]   ;;  %s804_s1 = inlined_call_operand.vmem [shape: f32[1,32], index: 1, kind: input, shape index: {}]   ;;  %s805_s2 = inlined_call_operand.hbm [shape: f32[1,32], index: 2, kind: input, shape index: {}]   ;;  %s806_s3 = inlined_call_operand.hbm [shape: bf16[32,192], index: 3, kind: input, shape index: {}]   ;;  %s807_s4 = inlined_call_operand.vmem [shape: bf16[2,8,192], index: 4, kind: output, shape index: {}]  }
   0x1   :  { %10 = vsyncpa [#allocation5], 0  ;;  %s677_s15 = smov 0   ;;  %s679_s16 = smov 0  }
   0x2   :  { %s681_s17 = smov 0  }
   0x3 LB: > { %s479_s18 = sadd.s32 4294967295, %s645_s17   ;;  %s28_s19 = sadd.s32 1, %s641_s16  ;;  %s645_s17 = sphi %s681_s17, %s16_s17   ;;  %s641_s16 = sphi %s679_s16, %s817_s16   ;;  %s637_s15 = sphi %s677_s15, %s816_s15  }
   0x4   : > { %p30_p0 = scmp.ge.s32.totalorder %s28_s19, 2  ;;  %p481_p1 = scmp.ge.s32.totalorder %s645_s17, 1 }
   0x5   : > { %p152_p2 = scmp.lt.s32.totalorder %s645_s17, 3  ;;  %p702_p4 = scmp.eq.s32.totalorder %s479_s18, 0 }
   0x6   : > { %s819_s19 = smov (%p30_p0, %s28_s19), 0  ;;  %s647_s22 = smov [#allocation2]  }
   0x7   : > { %p698_p3 = pnand %p481_p1, %p152_p2  ;;  %s168_s23 = sshll.u32 %s647_s22, 4  ;;  %s169_s23 = int_to_ptr.vmem [resolvable:$true] %s168_s23 }
   0x8   : > { %s812_s21 = scalar_select %p702_p4, 1, 0 }
   0x9   : > { %s811_s20 = scalar_select %p698_p3, 1, 0 }
   0xa   : > { %p511_p5 = pneg %p698_p3  ;;  %s648_s24 = smov [#allocation4]  }
   0xb   : > { %s178_s25 = sshll.u32 %s648_s24, 4  ;;  %s559_s29 = scalar_lea.hbm %s805_s2, 16  ;;  %s714_s25 = int_to_ptr.vmem [resolvable:$true] %s178_s25 }
   0xc   : > { %p710_p6 = pnand %p702_p4, %p511_p5  ;;  %p560_p7 = scmp.ne.s32.totalorder %s805_s2, %s559_s29 }
   0xd   : > { %p566_p11 = scmp.lt.u32.totalorder %s559_s29, %s805_s2 }
   0xe   : > { %p561_p8 = pneg %p710_p6 }
  0x10   : > { %p562_p9 = pnand %p561_p8, %p560_p7 }
  0x12   : > { %p563_p10 = pneg %p562_p9 }
  0x14   : > { %p568_p12 = pnand %p566_p11, %p563_p10 }
  0x16   : > { %571 = shalt.err (!%p568_p12)
}
  0x17   : > { %s572_s8 = scalar_lea.vmem %s169_s23, 16  ;;  %s579_s9 = scalar_lea.vmem %s169_s23, 32 }
  0x18   : > { %p573_p13 = scmp.ne.s32.totalorder %s169_s23, %s572_s8  ;;  %p580_p2 = scmp.lt.s32.totalorder %s169_s23, %s169_s23 }
  0x19   : > { %p581_p5 = scmp.lt.s32.totalorder %s579_s9, %s572_s8 }
  0x1a   : > { %p575_p0 = pnand %p573_p13, %p561_p8 }
  0x1b   : > { %p582_p4 = por %p581_p5, %p580_p2 }
  0x1c   : > { %p576_p1 = pneg %p575_p0 }
  0x1e   : > { %p583_p3 = pnand %p582_p4, %p576_p1 }
  0x20   : > { %586 = shalt.err (!%p583_p3)
}
  0x21   : > { %514 = dma.hbm_to_vmem [thread:$0]  (!%p710_p6), %s805_s2, 16, %s169_s23, [#allocation3]  }
  0x22   : > { %s587_s14 = scalar_lea.hbm %s806_s3, 512 }
  0x23   : > { %p588_p7 = scmp.ne.s32.totalorder %s806_s3, %s587_s14  ;;  %p594_p3 = scmp.lt.u32.totalorder %s587_s14, %s806_s3 }
  0x25   : > { %p590_p9 = pnand %p588_p7, %p561_p8 }
  0x27   : > { %p591_p4 = pneg %p590_p9 }
  0x29   : > { %p596_p10 = pnand %p594_p3, %p591_p4 }
  0x2b   : > { %599 = shalt.err (!%p596_p10)
}
  0x2c   : > { %s600_s23 = scalar_lea.vmem %s714_s25, 512  ;;  %p608_p0 = scmp.lt.s32.totalorder %s714_s25, %s714_s25 }
  0x2d   : > { %p601_p11 = scmp.ne.s32.totalorder %s714_s25, %s600_s23  ;;  %p609_p1 = scmp.lt.s32.totalorder %s600_s23, %s600_s23 }
  0x2f   : > { %p603_p12 = pnand %p601_p11, %p561_p8  ;;  %p610_p2 = por %p609_p1, %p608_p0 }
  0x31   : > { %p604_p13 = pneg %p603_p12 }
  0x33   : > { %p611_p5 = pnand %p610_p2, %p604_p13 }
  0x35   : > { %614 = shalt.err (!%p611_p5)
}
  0x36   : > { %s649_s28 = smov 128   ;;  %s650_s29 = smov 8  }
  0x37   : > { %517 = dma.hbm_to_vmem [thread:$0]  (!%p710_p6), %s806_s3, 512, %s714_s25, [#allocation5], %s649_s28, %s649_s28, %s650_s29  }
  0x38   : > { %p814_p7 = scmp.ne.s32.totalorder %s811_s20, 0 }
  0x39   : > { %p815_p8 = scmp.ne.s32.totalorder (!%p814_p7), %s812_s21, 0 }
  0x3a   : > { %204 = sbr.rel (%p814_p7) target bundleno = 605 (0x25d), region = 36 }
  0x41   : > { %628 = dma.done.wait (%p815_p8), [#allocation3], 16  }
  0x42   : > { %630 = vsyncadd (%p815_p8), [#allocation3], 4294967280 }
  0x43   : > { %632 = dma.done.wait (%p815_p8), [#allocation5], 512  }
  0x44   : > { %634 = vsyncadd (%p815_p8), [#allocation5], 4294966784  ;;  %p240_p9 = scmp.lt.s32.totalorder %s637_s15, 1  ;;  %vm258_vm0 = vcmask 261120   ;;  %v551_v7 = vld [vmem:[#allocation4 + $0x4] ss:$8 sps:$4 sm:$0xff]  }
  0x45   : > { %v553_v8 = vld [vmem:[#allocation4] ss:$8 sps:$4 sm:$0xff]   ;;  %317 = vmatprep.subr.bf16.mxu0 %v551_v7  ;;  %v554_v9 = vld [vmem:[#allocation4 + $0x14] ss:$8 sps:$4 sm:$0xff]   ;;  %v556_v10 = vld [vmem:[#allocation4 + $0x10] ss:$8 sps:$4 sm:$0xff]  }
  0x46   : > { %s821_s15 = smov (!%p240_p9, %s637_s15), 1  ;;  %318 = vmatpush1.bf16.msra.mxu0 %v553_v8  ;;  %v651_v11 = vmov 0   ;;  %v491_v16 = vld [vmem:[%s804_s1] ss:$0 sm:$0xff]  ;;  %v492_v18 = vld [vmem:[#allocation2] ss:$0 sm:$0xff] }
  0x47   : > { %s488_s20 = sshll.u32 %s821_s15, 3  ;;  %349 = vmatprep.mubr.bf16.mxu0 %v651_v11  ;;  %319 = vmatprep.subr.bf16.mxu0 %v554_v9  ;;  %vm366_vm1 = vcmask 1043456   ;;  %vm367_vm2 = vcmask 523268  }
  0x48   : > { %s246_s6 = scalar_lea.vmem %s803_s0, %s488_s20  ;;  %s255_s10 = scalar_lea.vmem %s807_s4, %s488_s20  ;;  %vm368_vm3 = vmor %vm367_vm2, %vm366_vm1 }
  0x49   : > { %v257_v0 = vld [vmem:[%s246_s6] sm:$0xff] }
  0x4a   : > { %v259_v1 = vsel %vm258_vm0, %v257_v0, 0.0  ;;  %320 = vmatpush1.bf16.msra.mxu0 %v556_v10 }
  0x4b   : > { %260 = vadd.xlane.f32.xlu0 %v259_v1 }
  0xd8   : > { %v261_v2 = vpop.xlane.xlu0 %260 }
  0xd9   : > { %v263_v3 = vmul.f32 0.03125, %v261_v2 }
  0xdb   : > { %v264_v4 = vsub.f32 %v257_v0, %v263_v3 }
  0xdd   : > { %v265_v5 = vmul.f32 %v264_v4, %v264_v4 }
  0xdf   : > { %v266_v6 = vsel %vm258_vm0, %v265_v5, 0.0 }
  0xe0   : > { %267 = vadd.xlane.f32.xlu0 %v266_v6 }
 0x16d   : > { %v268_v12 = vpop.xlane.xlu0 %267 }
 0x16e   : > { %v269_v13 = vmul.f32 0.03125, %v268_v12 }
 0x170   : > { %v270_v14 = vadd.f32 1e-05, %v269_v13 }
 0x172   : > { %557 = vrsqrt.f32 %v270_v14 }
 0x17c   : > { %v558_v15 = vpop.eup %557 }
 0x17d   : > { %v272_v17 = vmul.f32 %v558_v15, %v264_v4 }
 0x17f   : > { %v280_v19 = vmul.f32 %v491_v16, %v272_v17 }
 0x181   : > { %v288_v20 = vadd.f32 %v492_v18, %v280_v19 }
 0x183   : > { %v289_v21 = vpack.c.bf16 %v288_v20, %v288_v20 }
 0x185   : > { %497 = vmatmul.mubr.msk.bf16.vlgmr.msra.gmra.mrb[0].mxu0 %vm258_vm0, %v289_v21 }
 0x258   : > { %v351_v22 = vpop.f32.mrb[0].mxu0 }
 0x259   : > { %v353_v23 = vpop.f32.mrb[1].mxu0 }
 0x25a   : > { %v502_v24 = vpack.c.bf16 %v353_v23, %v351_v22  ;;  %v355_v25 = vpop.f32.mrb[2].mxu0 }
 0x25b   : > { %v356_v26 = vpop.f32.mrb[3].mxu0 }
 0x25c   : > { %369 = vst.msk [vmem:[%s255_s10] sm:$0xff] %vm368_vm3, %v502_v24 }
 0x25d PF: > { %s16_s17 = sadd.s32 1, %s645_s17   ;;  %s816_s15 = smov %s641_s16 }
 0x25e   : > { %p13_p6 = scmp.ge.s32.totalorder %s16_s17, 4   ;;  %s817_s16 = smov %s819_s19 }
 0x260   :  { %15 = sbr.rel (!%p13_p6) target bundleno = 3 (0x3), region = 75 }
 0x267   :  { %399 = vsyncpa [#allocation3], 1 }
 0x268   :  { %401 = vsyncpa [#allocation3 + $0x1], 1 }
 0x269   :  { %402 = vsyncpa [#allocation5], 1 }

// kernel: transformer_block.4
= control target key start
LH: loop header
LB: loop body
LE: loop exit
PB: predicated region body
PF: predicated region fallthrough
CT: control target
= control target key end

     0   :  { %s878_s12 = smov 0   ;;  %s955_s0 = inlined_call_operand.vmem [shape: bf16[2,4,8,16], index: 0, kind: input, shape index: {}]   ;;  %s956_s1 = inlined_call_operand.vmem [shape: bf16[2,4,8,16], index: 1, kind: input, shape index: {}]   ;;  %s957_s2 = inlined_call_operand.vmem [shape: bf16[2,4,8,16], index: 2, kind: input, shape index: {}]   ;;  %s958_s3 = inlined_call_operand.vmem [shape: bf16[2,4,8,16], index: 3, kind: output, shape index: {}]  }
   0x1 LB: > { %s731_s13 = sadd.s32 4294967295, %s854_s12   ;;  %p735_p0 = scmp.ge.s32.totalorder %s854_s12, 1  ;;  %s854_s12 = sphi %s878_s12, %s13_s12  }
   0x2   : > { %p157_p1 = scmp.lt.s32.totalorder %s854_s12, 3 }
   0x4   : > { %p158_p2 = pnand %p735_p0, %p157_p1 }
   0x5   : > { %p191_p3 = scmp.lt.s32.totalorder (!%p158_p2), %s731_s13, 1  ;;  %v856_v0 = vmov (!%p158_p2), 0.0   ;;  %vm857_vm0 = vmmov (!%p158_p2), 0   ;;  %vm224_vm1 = vcmask (!%p158_p2), 130048   ;;  %vm409_vm2 = vcmask (!%p158_p2), 64512  }
   0x6   : > { %161 = sbr.rel (%p158_p2) target bundleno = 780 (0x30c), region = 32  ;;  %774 = vmatprep.subr.bf16.mxu0 (!%p158_p2), %v856_v0  ;;  %780 = vmatprep.subr.bf16.mxu1 (!%p158_p2), %v856_v0  ;;  %vm461_vm3 = vcmask (!%p158_p2), 1043456   ;;  %vm647_vm4 = vcmask (!%p158_p2), 125952  }
   0x7   : > { %776 = vmatprep.mubr.msk.bf16.mxu0 (!%p158_p2), %vm857_vm0, %v856_v0  ;;  %782 = vmatprep.mubr.msk.bf16.mxu1 (!%p158_p2), %vm857_vm0, %v856_v0 }
   0xd   : > { %s960_s13 = smov (!%p191_p3, %s731_s13), 1 }
   0xe   : > { %s892_s14 = sshll.u32 %s960_s13, 4 }
   0xf   : > { %s200_s17 = scalar_lea.vmem %s956_s1, %s892_s14  ;;  %s195_s20 = scalar_lea.vmem %s955_s0, %s892_s14 }
  0x10   : > { %v216_v1 = vld [vmem:[%s200_s17] sm:$0xf]  ;;  %v217_v2 = vld [vmem:[%s200_s17 + $0x4] sm:$0xf]  ;;  %v218_v5 = vld [vmem:[%s200_s17 + $0x8] sm:$0xf]  ;;  %s205_s23 = scalar_lea.vmem %s957_s2, %s892_s14  ;;  %s210_s26 = scalar_lea.vmem %s958_s3, %s892_s14 }
  0x11   : > { %v229_v3 = vsel %vm224_vm1, %v216_v1, 0  ;;  %v275_v4 = vsel %vm224_vm1, %v217_v2, 0  ;;  %v219_v6 = vld [vmem:[%s200_s17 + $0xc] sm:$0xf]  ;;  %v212_v7 = vld [vmem:[%s195_s20] sm:$0xf] }
  0x12   : > { %775 = vmatpush3.bf16.xpose.msra.mxu0 %v229_v3  ;;  %781 = vmatpush3.bf16.xpose.msra.mxu1 %v275_v4  ;;  %v213_v8 = vld [vmem:[%s195_s20 + $0x4] sm:$0xf]  ;;  %v321_v9 = vsel %vm224_vm1, %v218_v5, 0  ;;  %v367_v10 = vsel %vm224_vm1, %v219_v6, 0  ;;  %v214_v11 = vld [vmem:[%s195_s20 + $0x8] sm:$0xf] }
  0x13   : > { %786 = vmatprep.subr.bf16.mxu0 %v856_v0  ;;  %792 = vmatprep.subr.bf16.mxu1 %v856_v0  ;;  %v215_v12 = vld [vmem:[%s195_s20 + $0xc] sm:$0xf]  ;;  %v220_v53 = vld [vmem:[%s205_s23] sm:$0xf]  ;;  %v221_v55 = vld [vmem:[%s205_s23 + $0x4] sm:$0xf] }
  0x14   : > { %v463_v54 = vsel %vm461_vm3, %v220_v53, 0  ;;  %v509_v56 = vsel %vm461_vm3, %v221_v55, 0  ;;  %v222_v57 = vld [vmem:[%s205_s23 + $0x8] sm:$0xf]  ;;  %v223_v59 = vld [vmem:[%s205_s23 + $0xc] sm:$0xf] }
  0x15   : > { %v555_v58 = vsel %vm461_vm3, %v222_v57, 0  ;;  %v601_v60 = vsel %vm461_vm3, %v223_v59, 0 }
  0x19   : > { %777 = vmatmul.mubr.msk.bf16.vlgmr.msra.gmra.mrb[0].mxu0 %vm224_vm1, %v212_v7  ;;  %783 = vmatmul.mubr.msk.bf16.vlgmr.msra.gmra.mrb[0].mxu1 %vm224_vm1, %v213_v8 }
  0x1a   : > { %787 = vmatpush3.bf16.xpose.msra.mxu0 %v321_v9  ;;  %793 = vmatpush3.bf16.xpose.msra.mxu1 %v367_v10 }
  0x1b   : > { %788 = vmatprep.mubr.msk.bf16.mxu0 %vm857_vm0, %v856_v0  ;;  %794 = vmatprep.mubr.msk.bf16.mxu1 %vm857_vm0, %v856_v0 }
  0x1c   : > { %798 = vmatprep.subr.bf16.mxu0 %v856_v0  ;;  %804 = vmatprep.subr.bf16.mxu1 %v856_v0 }
  0x21   : > { %789 = vmatmul.mubr.msk.bf16.vlgmr.msra.gmra.mrb[4].mxu0 %vm224_vm1, %v214_v11  ;;  %795 = vmatmul.mubr.msk.bf16.vlgmr.msra.gmra.mrb[4].mxu1 %vm224_vm1, %v215_v12 }
  0x22   : > { %800 = vmatprep.mubr.msk.bf16.mxu0 %vm857_vm0, %v856_v0  ;;  %806 = vmatprep.mubr.msk.bf16.mxu1 %vm857_vm0, %v856_v0 }
  0x23   : > { %799 = vmatpush3.bf16.msra.mxu0 %v463_v54  ;;  %805 = vmatpush3.bf16.msra.mxu1 %v509_v56 }
  0x24   : > { %810 = vmatprep.subr.bf16.mxu0 %v856_v0  ;;  %816 = vmatprep.subr.bf16.mxu1 %v856_v0 }
  0xec   : > { %v265_v13 = vpop.f32.mrb[0].mxu0  ;;  %v311_v14 = vpop.f32.mrb[0].mxu1 }
  0xed   : > { %v778_v15 = vpop.f32.mrb[1].mxu0  ;;  %v410_v16 = vsel %vm409_vm2, %v265_v13, -inf  ;;  %v784_v17 = vpop.f32.mrb[1].mxu1  ;;  %v413_v22 = vsel %vm409_vm2, %v311_v14, -inf }
  0xee   : > { %411 = vmax.xlane.f32.xlu0 %v410_v16  ;;  %v268_v18 = vpop.f32.mrb[2].mxu0  ;;  %v314_v19 = vpop.f32.mrb[2].mxu1 }
  0xef   : > { %v779_v20 = vpop.f32.mrb[3].mxu0  ;;  %v785_v21 = vpop.f32.mrb[3].mxu1 }
  0xf2   : > { %414 = vmax.xlane.f32.xlu0 %v413_v22 }
  0xf4   : > { %v357_v23 = vpop.f32.mrb[4].mxu0  ;;  %v403_v24 = vpop.f32.mrb[4].mxu1 }
  0xf5   : > { %v790_v25 = vpop.f32.mrb[5].mxu0  ;;  %v416_v26 = vsel %vm409_vm2, %v357_v23, -inf  ;;  %v796_v27 = vpop.f32.mrb[5].mxu1  ;;  %v419_v32 = vsel %vm409_vm2, %v403_v24, -inf }
  0xf6   : > { %417 = vmax.xlane.f32.xlu1 %v416_v26  ;;  %v360_v28 = vpop.f32.mrb[6].mxu0  ;;  %v406_v29 = vpop.f32.mrb[6].mxu1 }
  0xf7   : > { %v791_v30 = vpop.f32.mrb[7].mxu0  ;;  %v797_v31 = vpop.f32.mrb[7].mxu1 }
  0xfa   : > { %420 = vmax.xlane.f32.xlu1 %v419_v32 }
 0x17b   : > { %v412_v33 = vpop.xlane.xlu0 %411 }
 0x17c   : > { %v422_v34 = vsub.f32 %v265_v13, %v412_v33 }
 0x17e   : > { %v426_v35 = vmul.f32 1.442695, %v422_v34 }
 0x17f   : > { %v415_v36 = vpop.xlane.xlu0 %414 }
 0x180   : > { %832 = vpow2.f32 %v426_v35  ;;  %v423_v37 = vsub.f32 %v311_v14, %v415_v36 }
 0x182   : > { %v428_v38 = vmul.f32 1.442695, %v423_v37 }
 0x183   : > { %v418_v39 = vpop.xlane.xlu1 %417 }
 0x184   : > { %834 = vpow2.f32 %v428_v38  ;;  %v424_v40 = vsub.f32 %v357_v23, %v418_v39 }
 0x186   : > { %v430_v41 = vmul.f32 1.442695, %v424_v40 }
 0x187   : > { %v421_v42 = vpop.xlane.xlu1 %420 }
 0x188   : > { %836 = vpow2.f32 %v430_v41  ;;  %v425_v43 = vsub.f32 %v403_v24, %v421_v42 }
 0x18a   : > { %v833_v44 = vpop.eup %832  ;;  %v432_v45 = vmul.f32 1.442695, %v425_v43 }
 0x18b   : > { %v434_v46 = vsel %vm409_vm2, %v833_v44, 0.0 }
 0x18c   : > { %838 = vpow2.f32 %v432_v45  ;;  %435 = vadd.xlane.f32.xlu0 %v434_v46 }
 0x18e   : > { %v835_v47 = vpop.eup %834 }
 0x18f   : > { %v437_v48 = vsel %vm409_vm2, %v835_v47, 0.0 }
 0x190   : > { %438 = vadd.xlane.f32.xlu1 %v437_v48 }
 0x192   : > { %v837_v49 = vpop.eup %836 }
 0x193   : > { %v440_v50 = vsel %vm409_vm2, %v837_v49, 0.0 }
 0x194   : > { %441 = vadd.xlane.f32.xlu0 %v440_v50 }
 0x196   : > { %v839_v51 = vpop.eup %838 }
 0x197   : > { %v443_v52 = vsel %vm409_vm2, %v839_v51, 0.0 }
 0x198   : > { %444 = vadd.xlane.f32.xlu1 %v443_v52 }
 0x219   : > { %v436_v61 = vpop.xlane.xlu0 %435 }
 0x21a   : > { %840 = vrcp.f32 %v436_v61 }
 0x21d   : > { %v439_v62 = vpop.xlane.xlu1 %438 }
 0x21e   : > { %842 = vrcp.f32 %v439_v62 }
 0x221   : > { %v442_v63 = vpop.xlane.xlu0 %441 }
 0x222   : > { %844 = vrcp.f32 %v442_v63 }
 0x224   : > { %v841_v1 = vpop.eup %840 }
 0x225   : > { %v450_v2 = vmul.f32 %v841_v1, %v833_v44  ;;  %v445_v3 = vpop.xlane.xlu1 %444 }
 0x226   : > { %846 = vrcp.f32 %v445_v3 }
 0x227   : > { %v454_v4 = vpack.c.bf16 %v450_v2, %v450_v2 }
 0x228   : > { %v843_v5 = vpop.eup %842 }
 0x229   : > { %v451_v6 = vmul.f32 %v843_v5, %v835_v47  ;;  %801 = vmatmul.mubr.msk.bf16.vlgmr.msra.gmra.mrb[8].mxu0 %vm409_vm2, %v454_v4 }
 0x22a   : > { %811 = vmatpush3.bf16.msra.mxu0 %v555_v58  ;;  %812 = vmatprep.mubr.msk.bf16.mxu0 %vm857_vm0, %v856_v0 }
 0x22b   : > { %v455_v7 = vpack.c.bf16 %v451_v6, %v451_v6 }
 0x22c   : > { %v845_v8 = vpop.eup %844 }
 0x22d   : > { %v452_v9 = vmul.f32 %v845_v8, %v837_v49  ;;  %807 = vmatmul.mubr.msk.bf16.vlgmr.msra.gmra.mrb[8].mxu1 %vm409_vm2, %v455_v7 }
 0x22e   : > { %817 = vmatpush3.bf16.msra.mxu1 %v601_v60  ;;  %818 = vmatprep.mubr.msk.bf16.mxu1 %vm857_vm0, %v856_v0 }
 0x22f   : > { %v456_v10 = vpack.c.bf16 %v452_v9, %v452_v9 }
 0x230   : > { %v847_v11 = vpop.eup %846 }
 0x231   : > { %v453_v12 = vmul.f32 %v847_v11, %v839_v51  ;;  %813 = vmatmul.mubr.msk.bf16.vlgmr.msra.gmra.mrb[12].mxu0 %vm409_vm2, %v456_v10 }
 0x233   : > { %v457_v13 = vpack.c.bf16 %v453_v12, %v453_v12 }
 0x235   : > { %819 = vmatmul.mubr.msk.bf16.vlgmr.msra.gmra.mrb[12].mxu1 %vm409_vm2, %v457_v13 }
 0x2fc   : > { %v499_v14 = vpop.f32.mrb[8].mxu0 }
 0x2fd   : > { %v643_v15 = vpack.c.bf16 %v499_v14, %v499_v14  ;;  %v802_v16 = vpop.f32.mrb[9].mxu0 }
 0x2fe   : > { %v502_v17 = vpop.f32.mrb[10].mxu0 }
 0x2ff   : > { %648 = vst.msk [vmem:[%s210_s26] sm:$0xf] %vm647_vm4, %v643_v15  ;;  %v803_v0 = vpop.f32.mrb[11].mxu0 }
 0x300   : > { %v545_v18 = vpop.f32.mrb[8].mxu1 }
 0x301   : > { %v644_v19 = vpack.c.bf16 %v545_v18, %v545_v18  ;;  %v808_v20 = vpop.f32.mrb[9].mxu1 }
 0x302   : > { %v548_v21 = vpop.f32.mrb[10].mxu1 }
 0x303   : > { %649 = vst.msk [vmem:[%s210_s26 + $0x4] sm:$0xf] %vm647_vm4, %v644_v19  ;;  %v809_v22 = vpop.f32.mrb[11].mxu1 }
 0x304   : > { %v591_v23 = vpop.f32.mrb[12].mxu0 }
 0x305   : > { %v645_v24 = vpack.c.bf16 %v591_v23, %v591_v23  ;;  %v814_v25 = vpop.f32.mrb[13].mxu0 }
 0x306   : > { %v594_v26 = vpop.f32.mrb[14].mxu0 }
 0x307   : > { %650 = vst.msk [vmem:[%s210_s26 + $0x8] sm:$0xf] %vm647_vm4, %v645_v24  ;;  %v815_v27 = vpop.f32.mrb[15].mxu0 }
 0x308   : > { %v637_v28 = vpop.f32.mrb[12].mxu1 }
 0x309   : > { %v646_v29 = vpack.c.bf16 %v637_v28, %v637_v28  ;;  %v820_v30 = vpop.f32.mrb[13].mxu1 }
 0x30a   : > { %v640_v31 = vpop.f32.mrb[14].mxu1 }
 0x30b   : > { %651 = vst.msk [vmem:[%s210_s26 + $0xc] sm:$0xf] %vm647_vm4, %v646_v29  ;;  %v821_v32 = vpop.f32.mrb[15].mxu1 }
 0x30c PF: > { %s13_s12 = sadd.s32 1, %s854_s12  }
 0x30d   : > { %p10_p4 = scmp.ge.s32.totalorder %s13_s12, 4  }
 0x30f   :  { %12 = sbr.rel (!%p10_p4) target bundleno = 1 (0x1), region = 68 }

// kernel: transformer_block.5
= control target key start
LH: loop header
LB: loop body
LE: loop exit
PB: predicated region body
PF: predicated region fallthrough
CT: control target
= control target key end

     0   :  { %s1385_s0 = inlined_call_operand.vmem [shape: f32[2,8,32], index: 0, kind: input, shape index: {}]   ;;  %s1386_s1 = inlined_call_operand.vmem [shape: bf16[2,8,64], index: 1, kind: input, shape index: {}]   ;;  %s1387_s2 = inlined_call_operand.vmem [shape: bf16[64,32], index: 2, kind: input, shape index: {}]   ;;  %s1388_s3 = inlined_call_operand.vmem [shape: f32[1,32], index: 3, kind: input, shape index: {}]   ;;  %s1389_s4 = inlined_call_operand.vmem [shape: f32[1,32], index: 4, kind: input, shape index: {}]   ;;  %s1390_s5 = inlined_call_operand.vmem [shape: f32[1,32], index: 5, kind: input, shape index: {}]   ;;  %s1391_s6 = inlined_call_operand.vmem [shape: bf16[32,64], index: 6, kind: input, shape index: {}]   ;;  %s1392_s7 = inlined_call_operand.vmem [shape: f32[1,64], index: 7, kind: input, shape index: {}]   ;;  %s1393_s8 = inlined_call_operand.vmem [shape: bf16[64,32], index: 8, kind: input, shape index: {}]   ;;  %s1394_s9 = inlined_call_operand.vmem [shape: f32[1,32], index: 9, kind: input, shape index: {}]   ;;  %s1395_s10 = inlined_call_operand.hbm [shape: f32[2,8,32], index: 10, kind: output, shape index: {}]  }
   0x1   :  { %1396 = sst [smem:[#allocation7_spill]] %s1387_s2 }
   0x2   :  { %15 = vsyncpa [#allocation5], 0 }
   0x3   :  { %17 = vsyncpa [#allocation5 + $0x1], 0  ;;  %s1194_s13 = smov 0   ;;  %s1196_s14 = smov 0  }
   0x4   :  { %s1198_s15 = smov 0   ;;  %s1200_s16 = smov 0  }
   0x5   :  { %s1202_s17 = smov 0   ;;  %s1204_s18 = smov 0  }
   0x6 LB: > { %s907_s19 = sadd.s32 4294967295, %s1134_s18   ;;  %s908_s20 = sadd.s32 4294967294, %s1134_s18   ;;  %s1134_s18 = sphi %s1204_s18, %s23_s18   ;;  %s1130_s17 = sphi %s1202_s17, %s1404_s17   ;;  %s1126_s16 = sphi %s1200_s16, %s1403_s16   ;;  %s1122_s15 = sphi %s1198_s15, %s1402_s15   ;;  %s1118_s14 = sphi %s1196_s14, %s1401_s14   ;;  %s1114_s13 = sphi %s1194_s13, %s1400_s13  }
   0x7   : > { %s42_s21 = sadd.s32 1, %s1130_s17  ;;  %s290_s22 = sadd.s32 1, %s1122_s15 }
   0x8   : > { %p44_p0 = scmp.ge.s32.totalorder %s42_s21, 2  ;;  %p300_p1 = scmp.ne.s32.totalorder %s1122_s15, %s1118_s14 }
   0x9   : > { %p301_p2 = scmp.eq.s32.totalorder %s907_s19, 1  ;;  %p306_p3 = scmp.ne.s32.totalorder %s1118_s14, %s1114_s13 }
   0xa   : > { %s1406_s21 = smov (%p44_p0, %s42_s21), 0  ;;  %p307_p5 = scmp.eq.s32.totalorder %s908_s20, 1 }
   0xb   : > { %p1234_p4 = por %p301_p2, %p300_p1  ;;  %s285_s24 = ssub.s32 %s1130_s17, %s1406_s21 }
   0xc   : > { %p914_p6 = scmp.ge.s32.totalorder %s1134_s18, 1  ;;  %p288_p7 = scmp.eq.s32.totalorder %s285_s24, 0 }
   0xd   : > { %p1241_p8 = por %p307_p5, %p306_p3  ;;  %p382_p9 = scmp.lt.s32.totalorder %s1134_s18, 3 }
   0xe   : > { %s1247_s26 = scalar_select %p288_p7, %s1122_s15, %s290_s22  }
   0xf   : > { %p383_p10 = pnand %p914_p6, %p382_p9 }
  0x10   : > { %s1399_s2 = sld [smem:[#allocation7_spill]] (!%p383_p10)  ;;  %v1136_v1 = vmov (!%p383_p10), 0.0   ;;  %vm1137_vm0 = vmmov (!%p383_p10), 0   ;;  %p441_p11 = scmp.lt.s32.totalorder (!%p383_p10), %s1126_s16, 1  ;;  %vm507_vm1 = vcmask (!%p383_p10), 523264   ;;  %vm560_vm2 = vcmask (!%p383_p10), 261120  }
  0x11   : > { %386 = sbr.rel (%p383_p10) target bundleno = 1050 (0x41a), region = 60  ;;  %953 = vmatprep.subr.bf16.mxu0 (!%p383_p10), %v1136_v1  ;;  %965 = vmatprep.subr.bf16.mxu1 (!%p383_p10), %v1136_v1  ;;  %562 = vst.msk [vmem:[#allocation3] sm:$0xff] (!%p383_p10), %vm560_vm2, %v1136_v1  ;;  %v923_v8 = vld [vmem:[%s1388_s3] ss:$0 sm:$0xff] (!%p383_p10)  ;;  %v1047_v22 = vld [vmem:[%s1391_s6 + $0x8] sm:$0xff] (!%p383_p10)   ;;  %v1050_v35 = vld [vmem:[%s1393_s8 + $0x10] sm:$0xff] (!%p383_p10)  }
  0x12   : > { %961 = vmatprep.mubr.msk.bf16.mxu0 (!%p383_p10), %vm1137_vm0, %v1136_v1  ;;  %969 = vmatprep.mubr.msk.bf16.mxu1 (!%p383_p10), %vm1137_vm0, %v1136_v1  ;;  %v1046_v21 = vld [vmem:[%s1391_s6] sm:$0xff] (!%p383_p10)   ;;  %v1049_v34 = vld [vmem:[%s1393_s8 + $0x8] sm:$0xff] (!%p383_p10)   ;;  %v1051_v36 = vld [vmem:[%s1393_s8 + $0x18] sm:$0xff] (!%p383_p10)   ;;  %s438_s12 = sand.u32 (!%p383_p10), 1, %s1118_s14  }
  0x13   : > { %966 = vmatpush3.bf16.msra.mxu1 (!%p383_p10), %v1046_v21  ;;  %v924_v27 = vld [vmem:[%s1389_s4] ss:$0 sm:$0xff] (!%p383_p10)  ;;  %s915_s19 = sshll.u32 (!%p383_p10), %s438_s12, 3 }
  0x14   : > { %967 = vmatprep.subr.bf16.mxu1 (!%p383_p10), %v1136_v1  ;;  %v925_v29 = vld [vmem:[%s1390_s5] ss:$0 sm:$0xff] (!%p383_p10) }
  0x15   : > { %v1048_v33 = vld [vmem:[%s1393_s8] sm:$0xff] (!%p383_p10)  }
  0x16   : > { %v1042_v0 = vld [vmem:[%s1399_s2] sm:$0xff] (!%p383_p10)   ;;  %v1043_v2 = vld [vmem:[%s1399_s2 + $0x8] sm:$0xff] (!%p383_p10)   ;;  %v1044_v3 = vld [vmem:[%s1399_s2 + $0x10] sm:$0xff] (!%p383_p10)  }
  0x17   : > { %954 = vmatpush3.bf16.msra.mxu0 (!%p383_p10), %v1042_v0  ;;  %v1045_v4 = vld [vmem:[%s1399_s2 + $0x18] sm:$0xff] (!%p383_p10)   ;;  %968 = vmatpush3.bf16.msra.mxu1 (!%p383_p10), %v1047_v22  ;;  %v926_v37 = vld [vmem:[%s1392_s7] ss:$0 sm:$0xff] (!%p383_p10)  ;;  %s937_s2 = sshll.u32 (!%p383_p10), %s1126_s16, 7 }
  0x18   : > { %955 = vmatprep.subr.bf16.mxu0 %v1136_v1  ;;  %s442_s11 = scalar_select %p441_p11, %s1126_s16, 1  ;;  %973 = vmatprep.subr.bf16.mxu1 %v1136_v1  ;;  %v667_v49 = vld [vmem:[#allocation3] sm:$0xff]  ;;  %v935_v56 = vld [vmem:[%s1394_s9] ss:$0 sm:$0xff] }
  0x19   : > { %s1138_s16 = smov [#allocation4]  }
  0x1a   : > { %s917_s20 = sshll.u32 %s442_s11, 2  ;;  %s916_s30 = sshll.u32 %s442_s11, 3 }
  0x1b   : > { %956 = vmatpush3.bf16.msra.mxu0 %v1043_v2  ;;  %s454_s29 = scalar_lea.vmem %s1386_s1, %s917_s20  ;;  %s447_s22 = scalar_lea.vmem %s1385_s0, %s916_s30 }
  0x1c   : > { %957 = vmatprep.subr.bf16.mxu0 %v1136_v1  ;;  %v474_v5 = vld [vmem:[%s454_s29] sm:$0xf]  ;;  %s440_s11 = scalar_lea.vmem [#allocation4], %s915_s19  ;;  %s1337_s29 = scalar_lea.hbm %s1395_s10, %s937_s2 }
  0x1d   : > { %v473_v6 = vld [vmem:[%s447_s22] sm:$0xff]  ;;  %s776_s20 = sshll.u32 %s440_s11, 4  ;;  %s762_s30 = scalar_lea.sflag [#allocation5], %s438_s12  ;;  %s1339_s20 = int_to_ptr.vmem [resolvable:$true] %s776_s20 }
  0x1e   : > { %s1056_s22 = scalar_lea.vmem %s1339_s20, 128  ;;  %s1060_s19 = sshll.u32 %s1138_s16, 4  ;;  %s1061_s19 = int_to_ptr.vmem [resolvable:$false] %s1060_s19 }
  0x1f   : > { %958 = vmatpush3.bf16.msra.mxu0 %v1044_v3  ;;  %p1057_p12 = scmp.ne.s32.totalorder %s1339_s20, %s1056_s22  ;;  %s1062_s24 = scalar_lea.vmem %s1061_s19, 256 }
  0x20   : > { %959 = vmatprep.subr.bf16.mxu0 %v1136_v1  ;;  %p1063_p1 = scmp.lt.s32.totalorder %s1339_s20, %s1061_s19  ;;  %p1064_p2 = scmp.lt.s32.totalorder %s1062_s24, %s1056_s22 }
  0x21   : > { %p1058_p13 = pnand %p1057_p12, %p1234_p4 }
  0x22   : > { %p1065_p3 = por %p1064_p2, %p1063_p1 }
  0x23   : > { %960 = vmatpush3.bf16.msra.mxu0 %v1045_v4  ;;  %p1059_p0 = pneg %p1058_p13 }
  0x25   : > { %p1066_p5 = pnand %p1065_p3, %p1059_p0 }
  0x26   : > { %962 = vmatmul.mubr.msk.bf16.vlgmr.msra.gmra.mrb[0].mxu0 %vm507_vm1, %v474_v5 }
  0xf9   : > { %v545_v7 = vpop.f32.mrb[0].mxu0 }
  0xfa   : > { %v551_v9 = vadd.f32 %v545_v7, %v473_v6  ;;  %v963_v10 = vpop.f32.mrb[1].mxu0 }
  0xfb   : > { %v548_v11 = vpop.f32.mrb[2].mxu0 }
  0xfc   : > { %v559_v12 = vadd.f32 %v923_v8, %v551_v9  ;;  %v964_v13 = vpop.f32.mrb[3].mxu0 }
  0xfe   : > { %561 = vst.msk [vmem:[#allocation2] sm:$0xff] %vm560_vm2, %v559_v12 }
 0x105   : > { %v1285_v14 = vld [vmem:[#allocation2] sm:$0xff] }
 0x106   : > { %v565_v15 = vsel %vm560_vm2, %v1285_v14, 0.0 }
 0x107   : > { %566 = vadd.xlane.f32.xlu0 %v565_v15 }
 0x194   : > { %v567_v16 = vpop.xlane.xlu0 %566 }
 0x195   : > { %v569_v17 = vmul.f32 0.03125, %v567_v16 }
 0x197   : > { %v570_v18 = vsub.f32 %v1285_v14, %v569_v17 }
 0x199   : > { %v571_v19 = vmul.f32 %v570_v18, %v570_v18 }
 0x19b   : > { %v572_v20 = vsel %vm560_vm2, %v571_v19, 0.0 }
 0x19c   : > { %573 = vadd.xlane.f32.xlu0 %v572_v20 }
 0x229   : > { %v574_v23 = vpop.xlane.xlu0 %573 }
 0x22a   : > { %v575_v24 = vmul.f32 0.03125, %v574_v23 }
 0x22c   : > { %v576_v25 = vadd.f32 1e-05, %v575_v24 }
 0x22e   : > { %1052 = vrsqrt.f32 %v576_v25 }
 0x238   : > { %v1053_v26 = vpop.eup %1052 }
 0x239   : > { %v578_v28 = vmul.f32 %v1053_v26, %v570_v18 }
 0x23b   : > { %v586_v30 = vmul.f32 %v924_v27, %v578_v28 }
 0x23d   : > { %v594_v31 = vadd.f32 %v925_v29, %v586_v30 }
 0x23f   : > { %v595_v32 = vpack.c.bf16 %v594_v31, %v594_v31 }
 0x241   : > { %970 = vmatmul.mubr.msk.bf16.vlgmr.msra.gmra.mrb[0].mxu1 %vm560_vm2, %v595_v32 }
 0x242   : > { %981 = vmatprep.mubr.msk.bf16.mxu1 %vm1137_vm0, %v1136_v1  ;;  %974 = vmatpush3.bf16.msra.mxu1 %v1048_v33 }
 0x243   : > { %975 = vmatprep.subr.bf16.mxu1 %v1136_v1 }
 0x246   : > { %976 = vmatpush3.bf16.msra.mxu1 %v1049_v34 }
 0x247   : > { %977 = vmatprep.subr.bf16.mxu1 %v1136_v1 }
 0x24a   : > { %978 = vmatpush3.bf16.msra.mxu1 %v1050_v35 }
 0x24b   : > { %979 = vmatprep.subr.bf16.mxu1 %v1136_v1 }
 0x24e   : > { %980 = vmatpush3.bf16.msra.mxu1 %v1051_v36 }
 0x314   : > { %v656_v38 = vpop.f32.mrb[0].mxu1 }
 0x315   : > { %v657_v39 = vadd.f32 %v926_v37, %v656_v38  ;;  %v971_v40 = vpop.f32.mrb[1].mxu1 }
 0x316   : > { %v659_v41 = vpop.f32.mrb[2].mxu1 }
 0x317   : > { %v663_v42 = vmul.f32 0.70710677, %v657_v39  ;;  %v972_v43 = vpop.f32.mrb[3].mxu1  ;;  %v662_v45 = vmul.f32 0.5, %v657_v39 }
 0x319   : > { %1054 = verf.f32 %v663_v42 }
 0x323   : > { %v1055_v44 = vpop.eup %1054 }
 0x324   : > { %v665_v46 = vadd.f32 1.0, %v1055_v44 }
 0x326   : > { %v666_v47 = vmul.f32 %v665_v46, %v662_v45 }
 0x328   : > { %v668_v48 = vpack.c.bf16 %v666_v47, %v666_v47 }
 0x32a   : > { %982 = vmatmul.mubr.msk.bf16.vlgmr.msra.gmra.mrb[4].mxu1 %vm507_vm1, %v668_v48 }
 0x3fd   : > { %v739_v50 = vpop.f32.mrb[4].mxu1 }
 0x3fe   : > { %v745_v51 = vadd.f32 %v739_v50, %v667_v49  ;;  %v983_v52 = vpop.f32.mrb[5].mxu1 }
 0x3ff   : > { %v742_v53 = vpop.f32.mrb[6].mxu1 }
 0x400   : > { %746 = vst.msk [vmem:[#allocation3] sm:$0xff] %vm560_vm2, %v745_v51  ;;  %v984_v54 = vpop.f32.mrb[7].mxu1 }
 0x407   : > { %v750_v55 = vld [vmem:[#allocation3] sm:$0xff] }
 0x408   : > { %v751_v57 = vadd.f32 %v750_v55, %v1285_v14 }
 0x40a   : > { %v759_v58 = vadd.f32 %v935_v56, %v751_v57 }
 0x40c   : > { %760 = vst.msk [vmem:[%s440_s11] sm:$0xff] %vm560_vm2, %v759_v58 }
 0x40d   : > { %1069 = shalt.err (!%p1066_p5)
}
 0x40e   : > { %s1070_s12 = scalar_lea.hbm %s1337_s29, 128  ;;  %s1074_s27 = scalar_lea.hbm %s1395_s10, 256 }
 0x40f   : > { %p1071_p6 = scmp.ne.s32.totalorder %s1337_s29, %s1070_s12  ;;  %p1075_p10 = scmp.lt.u32.totalorder %s1337_s29, %s1395_s10 }
 0x410   : > { %p1076_p11 = scmp.lt.u32.totalorder %s1074_s27, %s1070_s12  ;;  %p1078_p13 = scmp.lt.u32.totalorder %s1070_s12, %s1337_s29 }
 0x411   : > { %p1072_p7 = pnand %p1071_p6, %p1234_p4 }
 0x412   : > { %p1077_p12 = por %p1076_p11, %p1075_p10 }
 0x413   : > { %p1073_p9 = pneg %p1072_p7 }
 0x414   : > { %p1079_p0 = por %p1078_p13, %p1077_p12 }
 0x416   : > { %p1080_p1 = pnand %p1079_p0, %p1073_p9 }
 0x418   : > { %1083 = shalt.err (!%p1080_p1)
}
 0x419   : > { %985 = dma.vmem_to_hbm [thread:$0]  (%p1234_p4), %s1339_s20, 128, %s1337_s29, %s762_s30  }
 0x41a PF: > { %p991_p2 = scmp.ge.s32.totalorder %s1134_s18, 2  ;;  %s788_s22 = sand.u32 1, %s1114_s13  }
 0x41b   : > { %s789_s19 = scalar_lea.sflag [#allocation5], %s788_s22 }
 0x41c   : > { %p988_p3 = pnand %p991_p2, %p1241_p8 }
 0x41e   : > { %1109 = dma.done.wait (!%p988_p3), %s789_s19, 128  }
 0x41f   : > { %1111 = vsyncadd (!%p988_p3), %s789_s19, 4294967168  ;;  %s23_s18 = sadd.s32 1, %s1134_s18   ;;  %s1400_s13 = smov %s1118_s14 }
 0x420   : > { %p20_p5 = scmp.ge.s32.totalorder %s23_s18, 4   ;;  %s1401_s14 = smov %s1122_s15 }
 0x421   : > { %s1402_s15 = smov %s1247_s26  ;;  %s1403_s16 = smov %s1130_s17 }
 0x422   : > { %s1404_s17 = smov %s1406_s21  ;;  %22 = sbr.rel (!%p20_p5) target bundleno = 6 (0x6), region = 115 }
 0x429   :  { %794 = vsyncpa [#allocation5], 1 }
 0x42a   :  { %796 = vsyncpa [#allocation5 + $0x1], 1 }

</bundles_post_ra>
